<compile_context>
chip_gen: v7x
topology: tpu7x:2x2x1
jax: 0.10.0
libtpu: 0.0.40
codegen_flags: <defaults>
</compile_context>

<pallas_src>
import functools

import jax
import jax.numpy as jnp
from jax.experimental import pallas as pl
from jax.experimental.pallas import tpu as pltpu

HIDDEN = 256
_LANE = 128
_SUBLANE = 8


def _cdiv(a, b):
    return -(-a // b)


def _round_up(x, m):
    return _cdiv(x, m) * m


def _device_kind():
    try:
        return jax.devices()[0].device_kind.lower()
    except Exception:
        return ""


def _fast_sigmoid(z):
    # logistic(z) == 0.5 * tanh(0.5 * z) + 0.5 : one EUP push (tanh) instead
    # of exp + divide (2 EUP pushes + Newton-iteration VALU filler).
    half = jnp.asarray(0.5, z.dtype)
    return jnp.tanh(z * half) * half + half


def _mlp_kernel(x_ref, w1_ref, b1_ref, w2_ref, b2_ref, w3_ref, b3_ref, o_ref,
                *, mxu_dtype, ew_dtype):
    # MXU operands in mxu_dtype (bf16 by default), f32 accumulation; bias add /
    # ReLU / sigmoid in ew_dtype (bf16 on v6e/v7x, f32 on v5e / exact path).
    x = x_ref[...].astype(mxu_dtype)

    # Layer 1: Linear + ReLU
    h1 = jnp.dot(x, w1_ref[...], preferred_element_type=jnp.float32)
    h1 = jnp.maximum(h1.astype(ew_dtype) + b1_ref[...], 0.0)

    # Layer 2: Linear + Sigmoid
    h2 = jnp.dot(h1.astype(mxu_dtype), w2_ref[...],
                 preferred_element_type=jnp.float32)
    h2 = _fast_sigmoid(h2.astype(ew_dtype) + b2_ref[...])

    # Layer 3: Linear + Sigmoid
    h3 = jnp.dot(h2.astype(mxu_dtype), w3_ref[...],
                 preferred_element_type=jnp.float32)
    o_ref[...] = _fast_sigmoid(h3.astype(ew_dtype) + b3_ref[...]).astype(o_ref.dtype)


def simple_model_forward(x, params, *, tm=1024, mxu_dtype=jnp.bfloat16,
                         ew_dtype=None, out_dtype=None):
    """x: [B, input_size] float32. params: dict of (w1,b1,w2,b2,w3,b3).

    Returns [B, output_size] in `out_dtype` (bf16 by default; f32 when
    mxu_dtype is f32)."""
    assert x.ndim == 2, f"wrong shape, got {x.shape}"
    B, d_in = x.shape
    out_size = params["w3"].shape[1]

    exact = jnp.dtype(mxu_dtype) == jnp.dtype(jnp.float32)
    kind = _device_kind()
    if ew_dtype is None:
        # bf16 VPU/EUP exists on v6e/v7x; keep f32 elementwise on v5e/unknown.
        has_bf16_vpu = ("v6" in kind) or ("v7" in kind)
        ew_dtype = jnp.bfloat16 if (has_bf16_vpu and not exact) else jnp.float32
    if out_dtype is None:
        # sigmoid output lives in [0,1]; bf16 halves the dominant HBM writeback.
        out_dtype = jnp.float32 if exact else jnp.bfloat16

    # Output columns: lane-pad to a multiple of 128 only when cheap (<=25%
    # extra columns); otherwise keep the exact width (full-extent last dim,
    # masked vst, but far fewer HBM bytes for tiny out_size).
    pad_to = _round_up(out_size, _LANE)
    out_cols = pad_to if (pad_to - out_size) * 4 <= out_size else out_size

    # Batch tiling: derive the tile from the tile count to avoid padding by up
    # to TM-1 rows; keep TM a multiple of 8 (sublane rule).
    tm_eff = max(_SUBLANE, _round_up(int(tm), _SUBLANE))
    n_tiles = _cdiv(B, tm_eff)
    if "v7" in kind and B >= 2 * _SUBLANE:
        # v7x has 2 TensorCores: give each at least one batch tile.
        n_tiles = max(n_tiles, 2)
        n_tiles += n_tiles % 2
    TM = _round_up(_cdiv(B, n_tiles), _SUBLANE)
    B_pad = n_tiles * TM
    x_p = x if B_pad == B else jnp.pad(x, ((0, B_pad - B), (0, 0)))

    # Weights in MXU dtype (tiny, VMEM-resident); biases in elementwise dtype.
    w1 = params["w1"].astype(mxu_dtype)
    w2 = params["w2"].astype(mxu_dtype)
    w3 = params["w3"].astype(mxu_dtype)
    b1 = params["b1"].astype(ew_dtype)
    b2 = params["b2"].astype(ew_dtype)
    b3 = params["b3"].astype(ew_dtype)
    if out_cols != out_size:
        w3 = jnp.pad(w3, ((0, 0), (0, out_cols - out_size)))
        b3 = jnp.pad(b3, ((0, 0), (0, out_cols - out_size)))

    grid = (B_pad // TM,)
    const2d = lambda i: (0, 0)  # weights/biases: same block every step

    out_itemsize = jnp.dtype(out_dtype).itemsize
    flops = 2 * B_pad * (d_in * HIDDEN + HIDDEN * HIDDEN + HIDDEN * out_cols)
    transcendentals = B_pad * (HIDDEN + out_cols)  # one tanh per sigmoid
    bytes_accessed = (
        x_p.size * x_p.dtype.itemsize
        + B_pad * out_cols * out_itemsize
        + sum(a.size * a.dtype.itemsize for a in (w1, b1, w2, b2, w3, b3))
    )

    out = pl.pallas_call(
        functools.partial(_mlp_kernel, mxu_dtype=mxu_dtype, ew_dtype=ew_dtype),
        out_shape=jax.ShapeDtypeStruct((B_pad, out_cols), out_dtype),
        grid=grid,
        in_specs=[
            pl.BlockSpec((TM, d_in), lambda i: (i, 0)),   # x: tiled over batch
            pl.BlockSpec((d_in, HIDDEN), const2d),        # w1 (VMEM-resident)
            pl.BlockSpec((1, HIDDEN), const2d),           # b1
            pl.BlockSpec((HIDDEN, HIDDEN), const2d),      # w2
            pl.BlockSpec((1, HIDDEN), const2d),           # b2
            pl.BlockSpec((HIDDEN, out_cols), const2d),    # w3
            pl.BlockSpec((1, out_cols), const2d),         # b3
        ],
        out_specs=pl.BlockSpec((TM, out_cols), lambda i: (i, 0)),
        compiler_params=pltpu.CompilerParams(
            dimension_semantics=(pltpu.PARALLEL,),   # batch axis across TCs
            vmem_limit_bytes=32 * 1024 * 1024,       # headroom for TM<=2048 on v5e
        ),
        cost_estimate=pl.CostEstimate(
            flops=flops,
            transcendentals=transcendentals,
            bytes_accessed=bytes_accessed,
        ),
    )(x_p, w1, b1, w2, b2, w3, b3)

    if B_pad != B or out_cols != out_size:
        out = out[:B, :out_size]
    return out


def init_params(key, input_size, output_size):
    """Deterministic synthetic init (PyTorch-style uniform fan-in bounds)."""
    ks = jax.random.split(key, 6)

    def linear(kw, kb, fan_in, fan_out):
        bound = 1.0 / jnp.sqrt(jnp.float32(fan_in))
        w = jax.random.uniform(kw, (fan_in, fan_out), jnp.float32, -bound, bound)
        b = jax.random.uniform(kb, (1, fan_out), jnp.float32, -bound, bound)
        return w, b

    w1, b1 = linear(ks[0], ks[1], input_size, HIDDEN)
    w2, b2 = linear(ks[2], ks[3], HIDDEN, HIDDEN)
    w3, b3 = linear(ks[4], ks[5], HIDDEN, output_size)
    return {"w1": w1, "b1": b1, "w2": w2, "b2": b2, "w3": w3, "b3": b3}


def _reference(x, p):
    h1 = jnp.maximum(x @ p["w1"] + p["b1"], 0.0)
    h2 = jax.nn.sigmoid(h1 @ p["w2"] + p["b2"])
    return jax.nn.sigmoid(h2 @ p["w3"] + p["b3"])


if __name__ == "__main__":
    key = jax.random.PRNGKey(0)
    k_x, k_p, k_x2, k_p2 = jax.random.split(key, 4)

    # --- small demo shape (unpadded / masked-store output path) ---
    batch, input_size, output_size = 2, 32, 8
    x = jax.random.normal(k_x, (batch, input_size), jnp.float32)
    params = init_params(k_p, input_size, output_size)

    y = simple_model_forward(x, params)
    jax.block_until_ready(y)
    y_ref = _reference(x, params)
    assert y.shape == (batch, output_size)
    # bf16 MXU operands / bf16 output -> small (~1e-3) deviation vs f32 ref.
    assert jnp.allclose(y.astype(jnp.float32), y_ref, atol=2e-2), \
        "bf16-path mismatch vs reference"

    # f32 MXU/elementwise/output path at tight tolerance.
    y_f32 = simple_model_forward(x, params, mxu_dtype=jnp.float32)
    jax.block_until_ready(y_f32)
    assert y_f32.shape == (batch, output_size) and y_f32.dtype == jnp.float32
    assert jnp.allclose(y_f32, y_ref, atol=1e-4), "f32-path mismatch vs reference"

    # --- larger shape: multi-tile grid, batch padding, lane-dense out path ---
    B2, in2, out2 = 2500, 64, 120  # out_size 120 -> padded to 128 (lane-dense)
    x2 = jax.random.normal(k_x2, (B2, in2), jnp.float32)
    params2 = init_params(k_p2, in2, out2)
    y2 = simple_model_forward(x2, params2, tm=1024)
    jax.block_until_ready(y2)
    y2_ref = _reference(x2, params2)
    assert y2.shape == (B2, out2)
    assert jnp.allclose(y2.astype(jnp.float32), y2_ref, atol=2e-2), \
        "large-batch bf16-path mismatch vs reference"

    print("KERNEL_OK")
</pallas_src>

<mosaic_0001>
module attributes {stable_mosaic.version = 11 : i64} {
  func.func @_mlp_kernel(%arg0: i32, %arg1: memref<8x32xf32, #tpu.memory_space<vmem>>, %arg2: memref<32x256xbf16, #tpu.memory_space<vmem>>, %arg3: memref<1x256xf32, #tpu.memory_space<vmem>>, %arg4: memref<256x256xbf16, #tpu.memory_space<vmem>>, %arg5: memref<1x256xf32, #tpu.memory_space<vmem>>, %arg6: memref<256x8xbf16, #tpu.memory_space<vmem>>, %arg7: memref<1x8xf32, #tpu.memory_space<vmem>>, %arg8: memref<8x8xbf16, #tpu.memory_space<vmem>>) attributes {dimension_semantics = [#tpu.dimension_semantics<parallel>], iteration_bounds = array<i64: 1>, scalar_prefetch = 0 : i64, scratch_operands = 0 : i64, tpu.core_type = #tpu.core_type<tc>, window_params = [{transform_indices = @transform_0, window_bounds = array<i64: 8, 32>}, {pipeline_mode = #tpu.pipeline_mode<synchronous>, transform_indices = @transform_1, window_bounds = array<i64: 32, 256>}, {pipeline_mode = #tpu.pipeline_mode<synchronous>, transform_indices = @transform_2, window_bounds = array<i64: 1, 256>}, {pipeline_mode = #tpu.pipeline_mode<synchronous>, transform_indices = @transform_3, window_bounds = array<i64: 256, 256>}, {pipeline_mode = #tpu.pipeline_mode<synchronous>, transform_indices = @transform_4, window_bounds = array<i64: 1, 256>}, {pipeline_mode = #tpu.pipeline_mode<synchronous>, transform_indices = @transform_5, window_bounds = array<i64: 256, 8>}, {pipeline_mode = #tpu.pipeline_mode<synchronous>, transform_indices = @transform_6, window_bounds = array<i64: 1, 8>}, {transform_indices = @transform_7, window_bounds = array<i64: 8, 8>}]} {
    %c0 = arith.constant 0 : index
    %c0_0 = arith.constant 0 : index
    %0 = vector.load %arg1[%c0, %c0_0] : memref<8x32xf32, #tpu.memory_space<vmem>>, vector<8x32xf32>
    %1 = arith.truncf %0 : vector<8x32xf32> to vector<8x32xbf16>
    %c0_1 = arith.constant 0 : index
    %c0_2 = arith.constant 0 : index
    %2 = vector.load %arg2[%c0_1, %c0_2] : memref<32x256xbf16, #tpu.memory_space<vmem>>, vector<32x256xbf16>
    %cst = arith.constant dense<0.000000e+00> : vector<8x256xf32>
    %3 = tpu.matmul %1, %2, %cst {dimension_numbers = #tpu.dot_dimension_numbers<[1], [0], [0], [1], [0, 0, 1, 1], [], []>} : vector<8x32xbf16>, vector<32x256xbf16>, vector<8x256xf32> -> vector<8x256xf32>
    %c0_3 = arith.constant 0 : index
    %c0_4 = arith.constant 0 : index
    %4 = vector.load %arg3[%c0_3, %c0_4] : memref<1x256xf32, #tpu.memory_space<vmem>>, vector<1x256xf32>
    %5 = vector.broadcast %4 : vector<1x256xf32> to vector<8x256xf32>
    %6 = arith.addf %3, %5 : vector<8x256xf32>
    %cst_5 = arith.constant 0.000000e+00 : f32
    %7 = vector.broadcast %cst_5 : f32 to vector<8x256xf32>
    %8 = arith.maximumf %6, %7 : vector<8x256xf32>
    %9 = arith.truncf %8 : vector<8x256xf32> to vector<8x256xbf16>
    %c0_6 = arith.constant 0 : index
    %c0_7 = arith.constant 0 : index
    %10 = vector.load %arg4[%c0_6, %c0_7] : memref<256x256xbf16, #tpu.memory_space<vmem>>, vector<256x256xbf16>
    %cst_8 = arith.constant dense<0.000000e+00> : vector<8x256xf32>
    %11 = tpu.matmul %9, %10, %cst_8 {dimension_numbers = #tpu.dot_dimension_numbers<[1], [0], [0], [1], [0, 0, 1, 1], [], []>} : vector<8x256xbf16>, vector<256x256xbf16>, vector<8x256xf32> -> vector<8x256xf32>
    %c0_9 = arith.constant 0 : index
    %c0_10 = arith.constant 0 : index
    %12 = vector.load %arg5[%c0_9, %c0_10] : memref<1x256xf32, #tpu.memory_space<vmem>>, vector<1x256xf32>
    %13 = vector.broadcast %12 : vector<1x256xf32> to vector<8x256xf32>
    %14 = arith.addf %11, %13 : vector<8x256xf32>
    %cst_11 = arith.constant 5.000000e-01 : f32
    %15 = vector.broadcast %cst_11 : f32 to vector<8x256xf32>
    %16 = arith.mulf %14, %15 : vector<8x256xf32>
    %17 = math.tanh %16 : vector<8x256xf32>
    %cst_12 = arith.constant 5.000000e-01 : f32
    %18 = vector.broadcast %cst_12 : f32 to vector<8x256xf32>
    %19 = arith.mulf %17, %18 : vector<8x256xf32>
    %cst_13 = arith.constant 5.000000e-01 : f32
    %20 = vector.broadcast %cst_13 : f32 to vector<8x256xf32>
    %21 = arith.addf %19, %20 : vector<8x256xf32>
    %22 = arith.truncf %21 : vector<8x256xf32> to vector<8x256xbf16>
    %c0_14 = arith.constant 0 : index
    %c0_15 = arith.constant 0 : index
    %23 = vector.load %arg6[%c0_14, %c0_15] : memref<256x8xbf16, #tpu.memory_space<vmem>>, vector<256x8xbf16>
    %cst_16 = arith.constant dense<0.000000e+00> : vector<8x8xf32>
    %24 = tpu.matmul %22, %23, %cst_16 {dimension_numbers = #tpu.dot_dimension_numbers<[1], [0], [0], [1], [0, 0, 1, 1], [], []>} : vector<8x256xbf16>, vector<256x8xbf16>, vector<8x8xf32> -> vector<8x8xf32>
    %c0_17 = arith.constant 0 : index
    %c0_18 = arith.constant 0 : index
    %25 = vector.load %arg7[%c0_17, %c0_18] : memref<1x8xf32, #tpu.memory_space<vmem>>, vector<1x8xf32>
    %26 = vector.broadcast %25 : vector<1x8xf32> to vector<8x8xf32>
    %27 = arith.addf %24, %26 : vector<8x8xf32>
    %cst_19 = arith.constant 5.000000e-01 : f32
    %28 = vector.broadcast %cst_19 : f32 to vector<8x8xf32>
    %29 = arith.mulf %27, %28 : vector<8x8xf32>
    %30 = math.tanh %29 : vector<8x8xf32>
    %cst_20 = arith.constant 5.000000e-01 : f32
    %31 = vector.broadcast %cst_20 : f32 to vector<8x8xf32>
    %32 = arith.mulf %30, %31 : vector<8x8xf32>
    %cst_21 = arith.constant 5.000000e-01 : f32
    %33 = vector.broadcast %cst_21 : f32 to vector<8x8xf32>
    %34 = arith.addf %32, %33 : vector<8x8xf32>
    %35 = arith.truncf %34 : vector<8x8xf32> to vector<8x8xbf16>
    %c0_22 = arith.constant 0 : index
    %c0_23 = arith.constant 0 : index
    %36 = vector.load %arg8[%c0_22, %c0_23] : memref<8x8xbf16, #tpu.memory_space<vmem>>, vector<8x8xbf16>
    tpu.vector_store %arg8[%c0_22, %c0_23], %35 {strides = array<i32>} : memref<8x8xbf16, #tpu.memory_space<vmem>>, vector<8x8xbf16>,
    return
  }
  func.func @transform_0(%arg0: i32) -> (i32, i32) {
    %c0_i32 = arith.constant 0 : i32
    %c0_i32_0 = arith.constant 0 : i32
    return %arg0, %c0_i32 : i32, i32
  }
  func.func @transform_1(%arg0: i32) -> (i32, i32) {
    %c0_i32 = arith.constant 0 : i32
    %c0_i32_0 = arith.constant 0 : i32
    %c0_i32_1 = arith.constant 0 : i32
    return %c0_i32, %c0_i32_0 : i32, i32
  }
  func.func @transform_2(%arg0: i32) -> (i32, i32) {
    %c0_i32 = arith.constant 0 : i32
    %c0_i32_0 = arith.constant 0 : i32
    %c0_i32_1 = arith.constant 0 : i32
    return %c0_i32, %c0_i32_0 : i32, i32
  }
  func.func @transform_3(%arg0: i32) -> (i32, i32) {
    %c0_i32 = arith.constant 0 : i32
    %c0_i32_0 = arith.constant 0 : i32
    %c0_i32_1 = arith.constant 0 : i32
    return %c0_i32, %c0_i32_0 : i32, i32
  }
  func.func @transform_4(%arg0: i32) -> (i32, i32) {
    %c0_i32 = arith.constant 0 : i32
    %c0_i32_0 = arith.constant 0 : i32
    %c0_i32_1 = arith.constant 0 : i32
    return %c0_i32, %c0_i32_0 : i32, i32
  }
  func.func @transform_5(%arg0: i32) -> (i32, i32) {
    %c0_i32 = arith.constant 0 : i32
    %c0_i32_0 = arith.constant 0 : i32
    %c0_i32_1 = arith.constant 0 : i32
    return %c0_i32, %c0_i32_0 : i32, i32
  }
  func.func @transform_6(%arg0: i32) -> (i32, i32) {
    %c0_i32 = arith.constant 0 : i32
    %c0_i32_0 = arith.constant 0 : i32
    %c0_i32_1 = arith.constant 0 : i32
    return %c0_i32, %c0_i32_0 : i32, i32
  }
  func.func @transform_7(%arg0: i32) -> (i32, i32) {
    %c0_i32 = arith.constant 0 : i32
    %c0_i32_0 = arith.constant 0 : i32
    return %arg0, %c0_i32 : i32, i32
  }
}

</mosaic_0001>

<bundles_post_ra>
// kernel: tpu_custom_call.1
= control target key start
LH: loop header
LB: loop body
LE: loop exit
PB: predicated region body
PF: predicated region fallthrough
CT: control target
= control target key end

     0   :  { %12 = vsyncpa [#allocation3], 0  ;;  %s927_s0 = inlined_call_operand.vmem [shape: f32[8,32], index: 0, kind: input, shape index: {}]   ;;  %s928_s1 = inlined_call_operand.vmem [shape: bf16[32,256], index: 1, kind: input, shape index: {}]   ;;  %s929_s2 = inlined_call_operand.vmem [shape: f32[1,256], index: 2, kind: input, shape index: {}]   ;;  %s930_s3 = inlined_call_operand.hbm [shape: bf16[256,256], index: 3, kind: input, shape index: {}]   ;;  %s931_s4 = inlined_call_operand.vmem [shape: f32[1,256], index: 4, kind: input, shape index: {}]   ;;  %s932_s5 = inlined_call_operand.vmem [shape: bf16[256,8], index: 5, kind: input, shape index: {}]   ;;  %s933_s6 = inlined_call_operand.vmem [shape: f32[1,8], index: 6, kind: input, shape index: {}]   ;;  %s934_s7 = inlined_call_operand.hbm [shape: bf16[8,8], index: 7, kind: output, shape index: {}]  }
   0x1   :  { %13 = vsyncpa [#allocation4], 0  ;;  %s786_s24 = smov [#allocation2]   ;;  %s738_s28 = scalar_lea.hbm %s930_s3, 4096 }
   0x2   :  { %s25_s25 = sshll.u32 %s786_s24, 4  ;;  %p739_p0 = scmp.ne.s32.totalorder %s930_s3, %s738_s28  ;;  %s26_s25 = int_to_ptr.vmem [resolvable:$true] %s25_s25 }
   0x3   :  { %p742_p1 = scmp.lt.u32.totalorder %s738_s28, %s930_s3 }
   0x5   :  { %p744_p2 = pnand %p742_p1, %p739_p0 }
   0x7   :  { %747 = shalt.err (!%p744_p2)
}
   0x8   :  { %s748_s10 = scalar_lea.vmem %s26_s25, 4096  ;;  %p753_p4 = scmp.lt.s32.totalorder %s26_s25, %s26_s25 }
   0x9   :  { %p749_p3 = scmp.ne.s32.totalorder %s26_s25, %s748_s10  ;;  %p754_p5 = scmp.lt.s32.totalorder %s748_s10, %s748_s10 }
   0xb   :  { %p755_p6 = por %p754_p5, %p753_p4 }
   0xd   :  { %p756_p7 = pnand %p755_p6, %p749_p3 }
   0xf   :  { %759 = shalt.err (!%p756_p7)
}
  0x10   :  { %s787_s11 = smov 128   ;;  %s788_s12 = smov 8  }
  0x11   :  { %31 = dma.hbm_to_vmem [thread:$0]  %s930_s3, 4096, %s26_s25, [#allocation3], %s787_s11, %s787_s11, %s788_s12  }
  0x12   :  { %782 = dma.done.wait [#allocation3], 4096  }
  0x13   :  { %783 = vsyncadd [#allocation3], 4294963200  ;;  %v789_v0 = vmov 0   ;;  %v662_v1 = vld [vmem:[%s928_s1 + $0x4] ss:$8 sps:$4 sm:$0xff]   ;;  %vm80_vm0 = vcmask 261120   ;;  %v50_v43 = vlaneseq }
  0x14   :  { %116 = vmatprep.mubr.bf16.mxu0 %v789_v0  ;;  %v664_v2 = vld [vmem:[%s928_s1] ss:$8 sps:$4 sm:$0xff]   ;;  %84 = vmatprep.subr.bf16.mxu0 %v662_v1  ;;  %v665_v3 = vld [vmem:[%s928_s1 + $0x14] ss:$8 sps:$4 sm:$0xff]   ;;  %v667_v4 = vld [vmem:[%s928_s1 + $0x10] ss:$8 sps:$4 sm:$0xff]  }
  0x15   :  { %v42_v5 = vld [vmem:[%s927_s0] sm:$0xff]  ;;  %85 = vmatpush1.bf16.msra.mxu0 %v664_v2  ;;  %v671_v8 = vld [vmem:[#allocation2 + $0x14] ss:$8 sps:$4 sm:$0xff]   ;;  %v673_v10 = vld [vmem:[#allocation2 + $0x10] ss:$8 sps:$4 sm:$0xff]   ;;  %v51_v44 = vshrl.u32 %v50_v43, 7 }
  0x16   :  { %v668_v6 = vld [vmem:[#allocation2 + $0x4] ss:$8 sps:$4 sm:$0xff]   ;;  %86 = vmatprep.subr.bf16.mxu0 %v665_v3  ;;  %v670_v7 = vld [vmem:[#allocation2] ss:$8 sps:$4 sm:$0xff]   ;;  %v43_v9 = vpack.c.bf16 %v42_v5, %v42_v5  ;;  %v677_v13 = vld [vmem:[#allocation2 + $0x34] ss:$8 sps:$4 sm:$0xff]  }
  0x17   :  { %333 = vmatprep.subr.bf16.mxu1 %v668_v6  ;;  %v674_v11 = vld [vmem:[#allocation2 + $0x24] ss:$8 sps:$4 sm:$0xff]   ;;  %v676_v12 = vld [vmem:[#allocation2 + $0x20] ss:$8 sps:$4 sm:$0xff]   ;;  %v679_v14 = vld [vmem:[#allocation2 + $0x30] ss:$8 sps:$4 sm:$0xff]  }
  0x18   :  { %334 = vmatpush1.bf16.msra.mxu1 %v670_v7  ;;  %v680_v15 = vld [vmem:[#allocation2 + $0x44] ss:$8 sps:$4 sm:$0xff]   ;;  %v682_v16 = vld [vmem:[#allocation2 + $0x40] ss:$8 sps:$4 sm:$0xff]   ;;  %v683_v17 = vld [vmem:[#allocation2 + $0x54] ss:$8 sps:$4 sm:$0xff]  }
  0x19   :  { %87 = vmatpush1.bf16.msra.mxu0 %v667_v4  ;;  %335 = vmatprep.subr.bf16.mxu1 %v671_v8  ;;  %v685_v18 = vld [vmem:[#allocation2 + $0x50] ss:$8 sps:$4 sm:$0xff]   ;;  %v686_v19 = vld [vmem:[#allocation2 + $0x64] ss:$8 sps:$4 sm:$0xff]   ;;  %v688_v20 = vld [vmem:[#allocation2 + $0x60] ss:$8 sps:$4 sm:$0xff]  }
  0x1a   :  { %v689_v21 = vld [vmem:[#allocation2 + $0x74] ss:$8 sps:$4 sm:$0xff]   ;;  %v691_v22 = vld [vmem:[#allocation2 + $0x70] ss:$8 sps:$4 sm:$0xff]   ;;  %v692_v23 = vld [vmem:[#allocation2 + $0x84] ss:$8 sps:$4 sm:$0xff]  }
  0x1b   :  { %v694_v24 = vld [vmem:[#allocation2 + $0x80] ss:$8 sps:$4 sm:$0xff]   ;;  %v695_v25 = vld [vmem:[#allocation2 + $0x94] ss:$8 sps:$4 sm:$0xff]   ;;  %v697_v26 = vld [vmem:[#allocation2 + $0x90] ss:$8 sps:$4 sm:$0xff]  }
  0x1c   :  { %585 = vmatmul.mubr.msk.bf16.vlgmr.msra.gmra.mrb[0].mxu0 %vm80_vm0, %v43_v9  ;;  %336 = vmatpush1.bf16.msra.mxu1 %v673_v10  ;;  %v698_v27 = vld [vmem:[#allocation2 + $0xa4] ss:$8 sps:$4 sm:$0xff]   ;;  %v700_v28 = vld [vmem:[#allocation2 + $0xa0] ss:$8 sps:$4 sm:$0xff]   ;;  %v701_v29 = vld [vmem:[#allocation2 + $0xb4] ss:$8 sps:$4 sm:$0xff]  }
  0x1d   :  { %337 = vmatprep.subr.bf16.mxu1 %v674_v11  ;;  %v703_v30 = vld [vmem:[#allocation2 + $0xb0] ss:$8 sps:$4 sm:$0xff]   ;;  %v704_v31 = vld [vmem:[#allocation2 + $0xc4] ss:$8 sps:$4 sm:$0xff]   ;;  %v706_v32 = vld [vmem:[#allocation2 + $0xc0] ss:$8 sps:$4 sm:$0xff]  }
  0x1e   :  { %v707_v33 = vld [vmem:[#allocation2 + $0xd4] ss:$8 sps:$4 sm:$0xff]   ;;  %v709_v34 = vld [vmem:[#allocation2 + $0xd0] ss:$8 sps:$4 sm:$0xff]   ;;  %v710_v35 = vld [vmem:[#allocation2 + $0xe4] ss:$8 sps:$4 sm:$0xff]  }
  0x1f   :  { %v712_v36 = vld [vmem:[#allocation2 + $0xe0] ss:$8 sps:$4 sm:$0xff]   ;;  %v713_v37 = vld [vmem:[#allocation2 + $0xf4] ss:$8 sps:$4 sm:$0xff]   ;;  %v715_v38 = vld [vmem:[#allocation2 + $0xf0] ss:$8 sps:$4 sm:$0xff]  }
  0x20   :  { %338 = vmatpush1.bf16.msra.mxu1 %v676_v12  ;;  %v716_v39 = vld [vmem:[%s932_s5 + $0x40] sm:$0xff]   ;;  %v718_v41 = vld [vmem:[%s932_s5 + $0x48] sm:$0xff]   ;;  %v52_v45 = vsub.s32 0, %v51_v44  ;;  %v56_v47 = vsub.s32 1, %v51_v44  ;;  %v720_v60 = vld [vmem:[%s932_s5 + $0x50] sm:$0xff]   ;;  %s790_s8 = smov [#allocation5]  }
  0x21   :  { %339 = vmatprep.subr.bf16.mxu1 %v677_v13  ;;  %v717_v40 = vld [vmem:[%s932_s5] sm:$0xff]   ;;  %635 = vmatprep.subr.bf16.mxu0 %v716_v39  ;;  %v719_v42 = vld [vmem:[%s932_s5 + $0x8] sm:$0xff]   ;;  %v721_v61 = vld [vmem:[%s932_s5 + $0x10] sm:$0xff]   ;;  %s572_s9 = sshll.u32 %s790_s8, 4  ;;  %vm564_vm1 = vcmask 60416   ;;  %s573_s9 = int_to_ptr.vmem [resolvable:$true] %s572_s9 }
  0x22   :  { %636 = vmatpush3.bf16.msra.mxu0 %v717_v40  ;;  %v48_v46 = vld [vmem:[%s929_s2] sm:$0x3]  ;;  %v722_v62 = vld [vmem:[%s932_s5 + $0x58] sm:$0xff]   ;;  %v726_v2 = vld [vmem:[%s932_s5 + $0x68] sm:$0xff]   ;;  %s760_s10 = scalar_lea.vmem %s573_s9, 64  ;;  %p765_p9 = scmp.lt.s32.totalorder %s573_s9, %s573_s9 }
  0x23   :  { %637 = vmatprep.subr.bf16.mxu0 %v718_v41  ;;  %v53_v48 = vrot.slane %v48_v46, %v52_v45  ;;  %v57_v49 = vrot.slane %v48_v46, %v56_v47  ;;  %v723_v63 = vld [vmem:[%s932_s5 + $0x18] sm:$0xff]   ;;  %v724_v0 = vld [vmem:[%s932_s5 + $0x60] sm:$0xff]   ;;  %v727_v3 = vld [vmem:[%s932_s5 + $0x28] sm:$0xff]   ;;  %p761_p8 = scmp.ne.s32.totalorder %s573_s9, %s760_s10  ;;  %p766_p10 = scmp.lt.s32.totalorder %s760_s10, %s760_s10 }
  0x24   :  { %340 = vmatpush1.bf16.msra.mxu1 %v679_v14  ;;  %v725_v1 = vld [vmem:[%s932_s5 + $0x20] sm:$0xff]   ;;  %v728_v4 = vld [vmem:[%s932_s5 + $0x70] sm:$0xff]   ;;  %v730_v6 = vld [vmem:[%s932_s5 + $0x78] sm:$0xff]  }
  0x25   :  { %341 = vmatprep.subr.bf16.mxu1 %v680_v15  ;;  %v729_v5 = vld [vmem:[%s932_s5 + $0x30] sm:$0xff]   ;;  %v731_v7 = vld [vmem:[%s932_s5 + $0x38] sm:$0xff]   ;;  %v161_v8 = vld [vmem:[%s931_s4] sm:$0x3]  ;;  %p767_p11 = por %p766_p10, %p765_p9 }
  0x26   :  { %638 = vmatpush3.bf16.msra.mxu0 %v719_v42  ;;  %v166_v9 = vrot.slane %v161_v8, %v52_v45  ;;  %v170_v10 = vrot.slane %v161_v8, %v56_v47 }
  0x27   :  { %639 = vmatprep.subr.bf16.mxu0 %v720_v60  ;;  %p768_p12 = pnand %p767_p11, %p761_p8 }
  0x28   :  { %342 = vmatpush1.bf16.msra.mxu1 %v682_v16 }
  0x29   :  { %343 = vmatprep.subr.bf16.mxu1 %v683_v17 }
  0x2a   :  { %640 = vmatpush3.bf16.msra.mxu0 %v721_v61 }
  0x2b   :  { %641 = vmatprep.subr.bf16.mxu0 %v722_v62 }
  0x2c   :  { %344 = vmatpush1.bf16.msra.mxu1 %v685_v18 }
  0x2d   :  { %345 = vmatprep.subr.bf16.mxu1 %v686_v19 }
  0x2e   :  { %642 = vmatpush3.bf16.msra.mxu0 %v723_v63 }
  0x2f   :  { %643 = vmatprep.subr.bf16.mxu0 %v724_v0 }
  0x30   :  { %346 = vmatpush1.bf16.msra.mxu1 %v688_v20 }
  0x31   :  { %347 = vmatprep.subr.bf16.mxu1 %v689_v21 }
  0x32   :  { %644 = vmatpush3.bf16.msra.mxu0 %v725_v1 }
  0x33   :  { %645 = vmatprep.subr.bf16.mxu0 %v726_v2 }
  0x34   :  { %348 = vmatpush1.bf16.msra.mxu1 %v691_v22 }
  0x35   :  { %349 = vmatprep.subr.bf16.mxu1 %v692_v23 }
  0x36   :  { %646 = vmatpush3.bf16.msra.mxu0 %v727_v3 }
  0x37   :  { %647 = vmatprep.subr.bf16.mxu0 %v728_v4 }
  0x38   :  { %350 = vmatpush1.bf16.msra.mxu1 %v694_v24 }
  0x39   :  { %351 = vmatprep.subr.bf16.mxu1 %v695_v25 }
  0x3a   :  { %648 = vmatpush3.bf16.msra.mxu0 %v729_v5 }
  0x3b   :  { %649 = vmatprep.subr.bf16.mxu0 %v730_v6 }
  0x3c   :  { %352 = vmatpush1.bf16.msra.mxu1 %v697_v26 }
  0x3d   :  { %353 = vmatprep.subr.bf16.mxu1 %v698_v27 }
  0x3e   :  { %650 = vmatpush3.bf16.msra.mxu0 %v731_v7 }
  0x40   :  { %354 = vmatpush1.bf16.msra.mxu1 %v700_v28  ;;  %v618_v28 = vld [vmem:[%s933_s6] ss:$0 sm:$0xff] }
  0x41   :  { %355 = vmatprep.subr.bf16.mxu1 %v701_v29 }
  0x44   :  { %356 = vmatpush1.bf16.msra.mxu1 %v703_v30 }
  0x45   :  { %357 = vmatprep.subr.bf16.mxu1 %v704_v31 }
  0x48   :  { %358 = vmatpush1.bf16.msra.mxu1 %v706_v32 }
  0x49   :  { %359 = vmatprep.subr.bf16.mxu1 %v707_v33 }
  0x4c   :  { %360 = vmatpush1.bf16.msra.mxu1 %v709_v34 }
  0x4d   :  { %361 = vmatprep.subr.bf16.mxu1 %v710_v35 }
  0x50   :  { %362 = vmatpush1.bf16.msra.mxu1 %v712_v36 }
  0x51   :  { %363 = vmatprep.subr.bf16.mxu1 %v713_v37 }
  0x54   :  { %364 = vmatpush1.bf16.msra.mxu1 %v715_v38 }
  0xef   :  { %v118_v50 = vpop.f32.mrb[0].mxu0 }
  0xf0   :  { %v119_v51 = vadd.f32 %v118_v50, %v53_v48  ;;  %v120_v52 = vpop.f32.mrb[1].mxu0 }
  0xf1   :  { %v121_v53 = vadd.f32 %v120_v52, %v57_v49  ;;  %v122_v54 = vpop.f32.mrb[2].mxu0 }
  0xf2   :  { %v125_v55 = vmax.f32 %v119_v51, 0.0  ;;  %v123_v56 = vpop.f32.mrb[3].mxu0 }
  0xf3   :  { %v126_v57 = vmax.f32 %v121_v53, 0.0 }
  0xf4   :  { %v127_v59 = vpack.c.bf16 %v125_v55, %v125_v55 }
  0xf5   :  { %v128_v58 = vpack.c.bf16 %v126_v57, %v126_v57 }
  0xf7   :  { %365 = vmatprep.mubr.bf16.mxu1 %v128_v58 }
  0xf8   :  { %366 = vmatmul.mubr.bf16.vlgmr.msra.gmra.mrb[0].mxu1 %v127_v59 }
 0x1cb   :  { %v367_v11 = vpop.f32.mrb[0].mxu1 }
 0x1cc   :  { %v368_v12 = vadd.f32 %v367_v11, %v166_v9  ;;  %v369_v13 = vpop.f32.mrb[1].mxu1 }
 0x1cd   :  { %v370_v14 = vadd.f32 %v369_v13, %v170_v10  ;;  %v371_v15 = vpop.f32.mrb[2].mxu1 }
 0x1ce   :  { %v374_v16 = vmul.f32 0.5, %v368_v12  ;;  %v372_v17 = vpop.f32.mrb[3].mxu1 }
 0x1cf   :  { %v375_v18 = vmul.f32 0.5, %v370_v14 }
 0x1d0   :  { %732 = vtanh.f32 %v374_v16 }
 0x1d1   :  { %734 = vtanh.f32 %v375_v18 }
 0x1da   :  { %v733_v19 = vpop.eup %732 }
 0x1db   :  { %v735_v20 = vpop.eup %734  ;;  %v378_v21 = vmul.f32 0.5, %v733_v19 }
 0x1dc   :  { %v379_v22 = vmul.f32 0.5, %v735_v20 }
 0x1dd   :  { %v380_v23 = vadd.f32 0.5, %v378_v21 }
 0x1de   :  { %v381_v24 = vadd.f32 0.5, %v379_v22 }
 0x1df   :  { %v382_v26 = vpack.c.bf16 %v380_v23, %v380_v23 }
 0x1e0   :  { %v383_v25 = vpack.c.bf16 %v381_v24, %v381_v24 }
 0x1e2   :  { %551 = vmatprep.mubr.bf16.mxu0 %v383_v25 }
 0x1e3   :  { %552 = vmatmul.mubr.bf16.vlgmr.msra.gmra.mrb[4].mxu0 %v382_v26 }
 0x2b6   :  { %v651_v27 = vpop.f32.mrb[4].mxu0 }
 0x2b7   :  { %v652_v29 = vpop.f32.mrb[5].mxu0 }
 0x2b8   :  { %v653_v30 = vadd.f32 %v652_v29, %v651_v27  ;;  %v654_v31 = vpop.f32.mrb[6].mxu0 }
 0x2b9   :  { %v655_v32 = vpop.f32.mrb[7].mxu0 }
 0x2ba   :  { %v554_v33 = vadd.f32 %v653_v30, %v618_v28 }
 0x2bc   :  { %v559_v34 = vmul.f32 0.5, %v554_v33 }
 0x2be   :  { %736 = vtanh.f32 %v559_v34 }
 0x2c8   :  { %v737_v35 = vpop.eup %736 }
 0x2c9   :  { %v561_v36 = vmul.f32 0.5, %v737_v35 }
 0x2cb   :  { %v562_v37 = vadd.f32 0.5, %v561_v36 }
 0x2cd   :  { %v563_v38 = vpack.c.bf16 %v562_v37, %v562_v37 }
 0x2cf   :  { %565 = vst.msk [vmem:[#allocation5] sm:$0xf] %vm564_vm1, %v563_v38 }
 0x2d0   :  { %771 = shalt.err (!%p768_p12)
}
 0x2d1   :  { %s772_s11 = scalar_lea.hbm %s934_s7, 64 }
 0x2d2   :  { %p773_p13 = scmp.ne.s32.totalorder %s934_s7, %s772_s11  ;;  %p776_p0 = scmp.lt.u32.totalorder %s772_s11, %s934_s7 }
 0x2d4   :  { %p778_p1 = pnand %p776_p0, %p773_p13 }
 0x2d6   :  { %781 = shalt.err (!%p778_p1)
}
 0x2d7   :  { %575 = dma.vmem_to_hbm [thread:$0]  %s573_s9, 64, %s934_s7, [#allocation4]  }
 0x2d8   :  { %784 = dma.done.wait [#allocation4], 64  }
 0x2d9   :  { %785 = vsyncadd [#allocation4], 4294967232 }
 0x2da   :  { %579 = vsyncpa [#allocation3], 1 }
 0x2db   :  { %580 = vsyncpa [#allocation4], 1 }

</bundles_post_ra>
